<compile_context>
chip_gen: v6e
topology: v6e:2x2x1
jax: 0.10.0
libtpu: 0.0.40
codegen_flags: <defaults>
</compile_context>

<pallas_src>
import functools

import jax
import jax.numpy as jnp
from jax import lax
from jax.experimental import pallas as pl
from jax.experimental.pallas import tpu as pltpu


# ----------------------------- Pallas kernels ------------------------------

def pointer_gen_kernel(x_ref, attn_ref, idx_ref, wp_ref, bp_ref, wg_ref, bg_ref,
                       out_ref, *, inv_temp, v_ext):
    # One grid step == one batch row. Shapes:
    #   x_ref    (1, T, D)      attn_ref (1, T, S)     idx_ref (1, S, 1) int32
    #   wp_ref   (D, V_ext)     bp_ref   (1, V_ext)    (padded slots carry bias -1e30)
    #   wg_ref   (1, D)         bg_ref   (1, 1)
    #   out_ref  (1, T, V_ext)
    x = x_ref[0]                                                     # (T, D)

    # p_gen / alpha  (tiny: VPU multiply + cross-lane reduce, no MXU needed)
    pg = jnp.sum(x * wg_ref[...], axis=-1, keepdims=True) + bg_ref[...]   # (T, 1)
    alpha = 1.0 / (1.0 + jnp.exp(-pg))                               # sigmoid

    # vocab distribution: projection + softmax over the (padded) extended vocab.
    logit = jnp.dot(x, wp_ref[...], preferred_element_type=jnp.float32) + bp_ref[...]
    l = logit * inv_temp
    l = l - jnp.max(l, axis=-1, keepdims=True)
    e = jnp.exp(l)                                                   # padded slots -> exactly 0
    vocab_dist = e / jnp.sum(e, axis=-1, keepdims=True)              # (T, V_ext)
    vocab_part = alpha * vocab_dist

    # attention distribution softmax.
    a = attn_ref[0] * inv_temp                                       # (T, S)
    a = a - jnp.max(a, axis=-1, keepdims=True)
    ae = jnp.exp(a)
    attn_sm = ae / jnp.sum(ae, axis=-1, keepdims=True)
    attn_part = (1.0 - alpha) * attn_sm                              # (T, S)

    # scatter_add over the extended vocab == (T,S) @ one_hot(idx)(S,V_ext) on the MXU.
    idx = idx_ref[0]                                                 # (S, 1) int32
    cols = lax.broadcasted_iota(jnp.int32, (idx.shape[0], v_ext), 1)
    onehot = (cols == idx).astype(jnp.float32)                       # (S, V_ext)
    scat = jnp.dot(attn_part, onehot, preferred_element_type=jnp.float32)

    out_ref[0] = jnp.log(vocab_part + scat + 1e-18)


def log_softmax_kernel(x_ref, wp_ref, bp_ref, out_ref):
    # Non-pointer-gen branch: log_softmax(x @ W + b, -1), one batch row per grid step.
    x = x_ref[0]                                                     # (T, D)
    logit = jnp.dot(x, wp_ref[...], preferred_element_type=jnp.float32) + bp_ref[...]
    s = logit - jnp.max(logit, axis=-1, keepdims=True)
    lse = jnp.log(jnp.sum(jnp.exp(s), axis=-1, keepdims=True))
    out_ref[0] = s - lse


# ----------------------------- wrapper --------------------------------------

def generator_forward(params, x, attn_dist=None, enc_batch_extend_vocab=None,
                      max_oov_length=None, temp=1.0, pointer_gen=True):
    B, T, D = x.shape
    Wp = params["W_proj"]                 # (D, V)  (already x@W layout == Linear(d_model, vocab))
    bp = params["b_proj"]                 # (V,)
    V = Wp.shape[1]

    if not pointer_gen:
        return pl.pallas_call(
            log_softmax_kernel,
            grid=(B,),
            in_specs=[
                pl.BlockSpec((1, T, D), lambda b: (b, 0, 0)),
                pl.BlockSpec((D, V), lambda b: (0, 0)),
                pl.BlockSpec((1, V), lambda b: (0, 0)),
            ],
            out_specs=pl.BlockSpec((1, T, V), lambda b: (b, 0, 0)),
            out_shape=jax.ShapeDtypeStruct((B, T, V), jnp.float32),
            compiler_params=pltpu.CompilerParams(dimension_semantics=("parallel",)),
        )(x, Wp, bp.reshape(1, V))

    S = attn_dist.shape[-1]
    v_ext = V + int(max_oov_length)

    # One-time (trace-time) weight layout plumbing: pad projection to the extended vocab
    # width. Padded columns get bias -1e30 -> exp underflows to exactly 0 -> zero prob,
    # which reproduces torch.cat([vocab_dist_, extra_zeros], 2) while keeping the output
    # lane-dense and removing any in-kernel pad/concat.
    wp_ext = jnp.pad(Wp, ((0, 0), (0, v_ext - V)))
    bp_ext = jnp.pad(bp, (0, v_ext - V), constant_values=-1e30).reshape(1, v_ext)
    idx3 = enc_batch_extend_vocab.astype(jnp.int32).reshape(B, S, 1)
    wg = params["w_pgen"].reshape(1, D)
    bg = params["b_pgen"].reshape(1, 1)

    kernel = functools.partial(pointer_gen_kernel, inv_temp=1.0 / float(temp), v_ext=v_ext)
    return pl.pallas_call(
        kernel,
        grid=(B,),
        in_specs=[
            pl.BlockSpec((1, T, D), lambda b: (b, 0, 0)),
            pl.BlockSpec((1, T, S), lambda b: (b, 0, 0)),
            pl.BlockSpec((1, S, 1), lambda b: (b, 0, 0)),
            pl.BlockSpec((D, v_ext), lambda b: (0, 0)),
            pl.BlockSpec((1, v_ext), lambda b: (0, 0)),
            pl.BlockSpec((1, D), lambda b: (0, 0)),
            pl.BlockSpec((1, 1), lambda b: (0, 0)),
        ],
        out_specs=pl.BlockSpec((1, T, v_ext), lambda b: (b, 0, 0)),
        out_shape=jax.ShapeDtypeStruct((B, T, v_ext), jnp.float32),
        compiler_params=pltpu.CompilerParams(dimension_semantics=("parallel",)),
    )(x, attn_dist, idx3, wp_ext, bp_ext, wg, bg)


# ----------------------------- pure-JAX reference ---------------------------

def generator_reference(params, x, attn_dist, enc_ext, max_oov, temp, pointer_gen):
    logit = jnp.einsum("btd,dv->btv", x, params["W_proj"]) + params["b_proj"]
    if not pointer_gen:
        return jax.nn.log_softmax(logit, axis=-1)
    B, T, _ = x.shape
    pg = jnp.einsum("btd,d->bt", x, params["w_pgen"]) + params["b_pgen"][0]
    alpha = jax.nn.sigmoid(pg)[..., None]
    vocab_dist_ = alpha * jax.nn.softmax(logit / temp, axis=-1)
    attn_ = (1.0 - alpha) * jax.nn.softmax(attn_dist / temp, axis=-1)
    ext = jnp.concatenate([vocab_dist_, jnp.zeros((B, T, max_oov), jnp.float32)], axis=-1)

    def scat_row(row, idx_b, add_row):     # genuine scatter_add (duplicates accumulate)
        return row.at[idx_b].add(add_row)

    scat = jax.vmap(jax.vmap(scat_row, in_axes=(0, None, 0)), in_axes=(0, 0, 0))(
        ext, enc_ext, attn_)
    return jnp.log(scat + 1e-18)


# ----------------------------- main ------------------------------------------

if __name__ == "__main__":
    # small config: batch=2, tgt_seq=8, src_seq=10, d_model(hidden)=32, vocab=120, max_oov=8
    B, T, S, D = 2, 8, 10, 32
    V, MAX_OOV = 120, 8

    key = jax.random.PRNGKey(0)
    kx, ka, ki, kw, kb, kg = jax.random.split(key, 6)

    x = jax.random.normal(kx, (B, T, D), jnp.float32)
    attn_dist = jax.random.normal(ka, (B, T, S), jnp.float32)
    enc_ext = jax.random.randint(ki, (B, S), 0, V + MAX_OOV, dtype=jnp.int32)
    enc_ext = enc_ext.at[:, 1].set(enc_ext[:, 0])   # force duplicate indices (exercise accumulation)

    params = {
        "W_proj": 0.10 * jax.random.normal(kw, (D, V), jnp.float32),
        "b_proj": 0.05 * jax.random.normal(kb, (V,), jnp.float32),
        "w_pgen": 0.10 * jax.random.normal(kg, (D,), jnp.float32),
        "b_pgen": jnp.zeros((1,), jnp.float32),
    }
    # TODO(synk): self.emo_proj is defined in __init__ but never used in forward; not implemented.

    # pointer_gen = True branch
    fwd_pg = jax.jit(functools.partial(
        generator_forward, max_oov_length=MAX_OOV, temp=1.0, pointer_gen=True))
    out_pg = fwd_pg(params, x, attn_dist, enc_ext)
    jax.block_until_ready(out_pg)
    ref_pg = generator_reference(params, x, attn_dist, enc_ext, MAX_OOV, 1.0, True)
    assert out_pg.shape == (B, T, V + MAX_OOV)
    assert bool(jnp.all(jnp.isfinite(out_pg)))
    assert bool(jnp.allclose(out_pg, ref_pg, atol=2e-4, rtol=2e-4))

    # pointer_gen = False branch
    fwd_ls = jax.jit(functools.partial(generator_forward, pointer_gen=False))
    out_ls = fwd_ls(params, x)
    jax.block_until_ready(out_ls)
    ref_ls = generator_reference(params, x, None, None, 0, 1.0, False)
    assert out_ls.shape == (B, T, V)
    assert bool(jnp.allclose(out_ls, ref_ls, atol=2e-4, rtol=2e-4))

    print("KERNEL_OK")
</pallas_src>

<mosaic_0001>
module attributes {stable_mosaic.version = 11 : i64} {
  func.func @pointer_gen_kernel(%arg0: i32, %arg1: memref<1x8x32xf32, #tpu.memory_space<vmem>>, %arg2: memref<1x8x10xf32, #tpu.memory_space<vmem>>, %arg3: memref<1x10x1xi32, #tpu.memory_space<vmem>>, %arg4: memref<32x128xf32, #tpu.memory_space<vmem>>, %arg5: memref<1x128xf32, #tpu.memory_space<vmem>>, %arg6: memref<1x32xf32, #tpu.memory_space<vmem>>, %arg7: memref<1x1xf32, #tpu.memory_space<vmem>>, %arg8: memref<1x8x128xf32, #tpu.memory_space<vmem>>) attributes {dimension_semantics = [#tpu.dimension_semantics<parallel>], iteration_bounds = array<i64: 2>, scalar_prefetch = 0 : i64, scratch_operands = 0 : i64, tpu.core_type = #tpu.core_type<tc>, window_params = [{transform_indices = @transform_0, window_bounds = array<i64: 1, 8, 32>}, {transform_indices = @transform_1, window_bounds = array<i64: 1, 8, 10>}, {transform_indices = @transform_2, window_bounds = array<i64: 1, 10, 1>}, {pipeline_mode = #tpu.pipeline_mode<synchronous>, transform_indices = @transform_3, window_bounds = array<i64: 32, 128>}, {pipeline_mode = #tpu.pipeline_mode<synchronous>, transform_indices = @transform_4, window_bounds = array<i64: 1, 128>}, {pipeline_mode = #tpu.pipeline_mode<synchronous>, transform_indices = @transform_5, window_bounds = array<i64: 1, 32>}, {pipeline_mode = #tpu.pipeline_mode<synchronous>, transform_indices = @transform_6, window_bounds = array<i64: 1, 1>}, {transform_indices = @transform_7, window_bounds = array<i64: 1, 8, 128>}]} {
    %c0 = arith.constant 0 : index
    %c0_0 = arith.constant 0 : index
    %c0_1 = arith.constant 0 : index
    %0 = vector.load %arg1[%c0, %c0_0, %c0_1] : memref<1x8x32xf32, #tpu.memory_space<vmem>>, vector<1x8x32xf32>
    %1 = vector.shape_cast %0 : vector<1x8x32xf32> to vector<8x32xf32>
    %c0_2 = arith.constant 0 : index
    %c0_3 = arith.constant 0 : index
    %2 = vector.load %arg6[%c0_2, %c0_3] : memref<1x32xf32, #tpu.memory_space<vmem>>, vector<1x32xf32>
    %3 = vector.broadcast %2 : vector<1x32xf32> to vector<8x32xf32>
    %4 = arith.mulf %1, %3 : vector<8x32xf32>
    %cst = arith.constant dense<0.000000e+00> : vector<8xf32>
    %5 = vector.multi_reduction <add>, %4, %cst [1] : vector<8x32xf32> to vector<8xf32>
    %6 = vector.shape_cast %5 : vector<8xf32> to vector<8x1xf32>
    %c0_4 = arith.constant 0 : index
    %c0_5 = arith.constant 0 : index
    %7 = vector.load %arg7[%c0_4, %c0_5] : memref<1x1xf32, #tpu.memory_space<vmem>>, vector<1x1xf32>
    %8 = vector.broadcast %7 : vector<1x1xf32> to vector<8x1xf32>
    %9 = arith.addf %6, %8 : vector<8x1xf32>
    %cst_6 = arith.constant 0.000000e+00 : f32
    %10 = vector.broadcast %cst_6 : f32 to vector<8x1xf32>
    %11 = arith.subf %10, %9 : vector<8x1xf32>
    %12 = math.exp %11 : vector<8x1xf32>
    %cst_7 = arith.constant 1.000000e+00 : f32
    %13 = vector.broadcast %cst_7 : f32 to vector<8x1xf32>
    %14 = arith.addf %13, %12 : vector<8x1xf32>
    %cst_8 = arith.constant 1.000000e+00 : f32
    %15 = vector.broadcast %cst_8 : f32 to vector<8x1xf32>
    %16 = arith.divf %15, %14 : vector<8x1xf32>
    %c0_9 = arith.constant 0 : index
    %c0_10 = arith.constant 0 : index
    %17 = vector.load %arg4[%c0_9, %c0_10] : memref<32x128xf32, #tpu.memory_space<vmem>>, vector<32x128xf32>
    %cst_11 = arith.constant dense<0.000000e+00> : vector<8x128xf32>
    %18 = tpu.matmul %1, %17, %cst_11 {dimension_numbers = #tpu.dot_dimension_numbers<[1], [0], [0], [1], [0, 0, 1, 1], [], []>} : vector<8x32xf32>, vector<32x128xf32>, vector<8x128xf32> -> vector<8x128xf32>
    %c0_12 = arith.constant 0 : index
    %c0_13 = arith.constant 0 : index
    %19 = vector.load %arg5[%c0_12, %c0_13] : memref<1x128xf32, #tpu.memory_space<vmem>>, vector<1x128xf32>
    %20 = vector.broadcast %19 : vector<1x128xf32> to vector<8x128xf32>
    %21 = arith.addf %18, %20 : vector<8x128xf32>
    %cst_14 = arith.constant 1.000000e+00 : f32
    %22 = vector.broadcast %cst_14 : f32 to vector<8x128xf32>
    %23 = arith.mulf %21, %22 : vector<8x128xf32>
    %cst_15 = arith.constant dense<0xFF800000> : vector<8xf32>
    %24 = vector.multi_reduction <maximumf>, %23, %cst_15 [1] : vector<8x128xf32> to vector<8xf32>
    %25 = vector.shape_cast %24 : vector<8xf32> to vector<8x1xf32>
    %26 = vector.broadcast %25 : vector<8x1xf32> to vector<8x128xf32>
    %27 = arith.subf %23, %26 : vector<8x128xf32>
    %28 = math.exp %27 : vector<8x128xf32>
    %cst_16 = arith.constant dense<0.000000e+00> : vector<8xf32>
    %29 = vector.multi_reduction <add>, %28, %cst_16 [1] : vector<8x128xf32> to vector<8xf32>
    %30 = vector.shape_cast %29 : vector<8xf32> to vector<8x1xf32>
    %31 = vector.broadcast %30 : vector<8x1xf32> to vector<8x128xf32>
    %32 = arith.divf %28, %31 : vector<8x128xf32>
    %33 = vector.broadcast %16 : vector<8x1xf32> to vector<8x128xf32>
    %34 = arith.mulf %33, %32 : vector<8x128xf32>
    %c0_17 = arith.constant 0 : index
    %c0_18 = arith.constant 0 : index
    %c0_19 = arith.constant 0 : index
    %35 = vector.load %arg2[%c0_17, %c0_18, %c0_19] : memref<1x8x10xf32, #tpu.memory_space<vmem>>, vector<1x8x10xf32>
    %36 = vector.shape_cast %35 : vector<1x8x10xf32> to vector<8x10xf32>
    %cst_20 = arith.constant 1.000000e+00 : f32
    %37 = vector.broadcast %cst_20 : f32 to vector<8x10xf32>
    %38 = arith.mulf %36, %37 : vector<8x10xf32>
    %cst_21 = arith.constant dense<0xFF800000> : vector<8xf32>
    %39 = vector.multi_reduction <maximumf>, %38, %cst_21 [1] : vector<8x10xf32> to vector<8xf32>
    %40 = vector.shape_cast %39 : vector<8xf32> to vector<8x1xf32>
    %41 = vector.broadcast %40 : vector<8x1xf32> to vector<8x10xf32>
    %42 = arith.subf %38, %41 : vector<8x10xf32>
    %43 = math.exp %42 : vector<8x10xf32>
    %cst_22 = arith.constant dense<0.000000e+00> : vector<8xf32>
    %44 = vector.multi_reduction <add>, %43, %cst_22 [1] : vector<8x10xf32> to vector<8xf32>
    %45 = vector.shape_cast %44 : vector<8xf32> to vector<8x1xf32>
    %46 = vector.broadcast %45 : vector<8x1xf32> to vector<8x10xf32>
    %47 = arith.divf %43, %46 : vector<8x10xf32>
    %cst_23 = arith.constant 1.000000e+00 : f32
    %48 = vector.broadcast %cst_23 : f32 to vector<8x1xf32>
    %49 = arith.subf %48, %16 : vector<8x1xf32>
    %50 = vector.broadcast %49 : vector<8x1xf32> to vector<8x10xf32>
    %51 = arith.mulf %50, %47 : vector<8x10xf32>
    %c0_24 = arith.constant 0 : index
    %c0_25 = arith.constant 0 : index
    %c0_26 = arith.constant 0 : index
    %52 = vector.load %arg3[%c0_24, %c0_25, %c0_26] : memref<1x10x1xi32, #tpu.memory_space<vmem>>, vector<1x10x1xi32>
    %53 = vector.shape_cast %52 : vector<1x10x1xi32> to vector<10x1xi32>
    %54 = tpu.iota {dimensions = array<i32: 1>} : vector<10x128xi32>
    %55 = vector.broadcast %53 : vector<10x1xi32> to vector<10x128xi32>
    %56 = arith.cmpi eq, %54, %55 : vector<10x128xi32>
    %57 = arith.extui %56 : vector<10x128xi1> to vector<10x128xi32>
    %58 = arith.sitofp %57 : vector<10x128xi32> to vector<10x128xf32>
    %cst_27 = arith.constant dense<0.000000e+00> : vector<8x128xf32>
    %59 = tpu.matmul %51, %58, %cst_27 {dimension_numbers = #tpu.dot_dimension_numbers<[1], [0], [0], [1], [0, 0, 1, 1], [], []>} : vector<8x10xf32>, vector<10x128xf32>, vector<8x128xf32> -> vector<8x128xf32>
    %60 = arith.addf %34, %59 : vector<8x128xf32>
    %cst_28 = arith.constant 1.000000e-18 : f32
    %61 = vector.broadcast %cst_28 : f32 to vector<8x128xf32>
    %62 = arith.addf %60, %61 : vector<8x128xf32>
    %63 = math.log %62 : vector<8x128xf32>
    %c0_29 = arith.constant 0 : index
    %c0_30 = arith.constant 0 : index
    %c0_31 = arith.constant 0 : index
    %64 = vector.load %arg8[%c0_29, %c0_30, %c0_31] : memref<1x8x128xf32, #tpu.memory_space<vmem>>, vector<1x8x128xf32>
    %65 = vector.shape_cast %64 : vector<1x8x128xf32> to vector<8x128xf32>
    %66 = vector.shape_cast %63 : vector<8x128xf32> to vector<1x8x128xf32>
    tpu.vector_store %arg8[%c0_29, %c0_30, %c0_31], %66 {strides = array<i32>} : memref<1x8x128xf32, #tpu.memory_space<vmem>>, vector<1x8x128xf32>,
    return
  }
  func.func @transform_0(%arg0: i32) -> (i32, i32, i32) {
    %c0_i32 = arith.constant 0 : i32
    %c0_i32_0 = arith.constant 0 : i32
    %c0_i32_1 = arith.constant 0 : i32
    return %arg0, %c0_i32, %c0_i32_0 : i32, i32, i32
  }
  func.func @transform_1(%arg0: i32) -> (i32, i32, i32) {
    %c0_i32 = arith.constant 0 : i32
    %c0_i32_0 = arith.constant 0 : i32
    %c0_i32_1 = arith.constant 0 : i32
    return %arg0, %c0_i32, %c0_i32_0 : i32, i32, i32
  }
  func.func @transform_2(%arg0: i32) -> (i32, i32, i32) {
    %c0_i32 = arith.constant 0 : i32
    %c0_i32_0 = arith.constant 0 : i32
    %c0_i32_1 = arith.constant 0 : i32
    return %arg0, %c0_i32, %c0_i32_0 : i32, i32, i32
  }
  func.func @transform_3(%arg0: i32) -> (i32, i32) {
    %c0_i32 = arith.constant 0 : i32
    %c0_i32_0 = arith.constant 0 : i32
    %c0_i32_1 = arith.constant 0 : i32
    return %c0_i32, %c0_i32_0 : i32, i32
  }
  func.func @transform_4(%arg0: i32) -> (i32, i32) {
    %c0_i32 = arith.constant 0 : i32
    %c0_i32_0 = arith.constant 0 : i32
    %c0_i32_1 = arith.constant 0 : i32
    return %c0_i32, %c0_i32_0 : i32, i32
  }
  func.func @transform_5(%arg0: i32) -> (i32, i32) {
    %c0_i32 = arith.constant 0 : i32
    %c0_i32_0 = arith.constant 0 : i32
    %c0_i32_1 = arith.constant 0 : i32
    return %c0_i32, %c0_i32_0 : i32, i32
  }
  func.func @transform_6(%arg0: i32) -> (i32, i32) {
    %c0_i32 = arith.constant 0 : i32
    %c0_i32_0 = arith.constant 0 : i32
    %c0_i32_1 = arith.constant 0 : i32
    return %c0_i32, %c0_i32_0 : i32, i32
  }
  func.func @transform_7(%arg0: i32) -> (i32, i32, i32) {
    %c0_i32 = arith.constant 0 : i32
    %c0_i32_0 = arith.constant 0 : i32
    %c0_i32_1 = arith.constant 0 : i32
    return %arg0, %c0_i32, %c0_i32_0 : i32, i32, i32
  }
}

</mosaic_0001>

<bundles_post_ra>
// kernel: generator_forward.1
= control target key start
LH: loop header
LB: loop body
LE: loop exit
PB: predicated region body
PF: predicated region fallthrough
CT: control target
= control target key end

     0   :  { %s992_s0 = inlined_call_operand.vmem [shape: f32[2,8,32], index: 0, kind: input, shape index: {}]   ;;  %s993_s1 = inlined_call_operand.vmem [shape: f32[2,8,10], index: 1, kind: input, shape index: {}]   ;;  %s994_s2 = inlined_call_operand.vmem [shape: s32[2,10,1], index: 2, kind: input, shape index: {}]   ;;  %s995_s3 = inlined_call_operand.vmem [shape: f32[32,128], index: 3, kind: input, shape index: {}]   ;;  %s996_s4 = inlined_call_operand.vmem [shape: f32[1,128], index: 4, kind: input, shape index: {}]   ;;  %s997_s5 = inlined_call_operand.vmem [shape: f32[1,32], index: 5, kind: input, shape index: {}]   ;;  %s998_s6 = inlined_call_operand.<no memory space> [shape: f32[1,1], index: 6, kind: input, shape index: {}]   ;;  %s999_s7 = inlined_call_operand.hbm [shape: f32[2,8,128], index: 7, kind: output, shape index: {}]  }
   0x1   :  { %v12_v0 = vstv %s998_s6 }
   0x2   :  { %13 = vst [vmem:[#allocation2] sm:$0x1] %v12_v0 }
   0x3   :  { %14 = vsyncpa [#allocation4], 0 }
   0x4   :  { %16 = vsyncpa [#allocation4 + $0x1], 0  ;;  %s872_s26 = smov 0   ;;  %s874_s27 = smov 0  }
   0x5   :  { %s876_s28 = smov 0   ;;  %s878_s29 = smov 0  }
   0x6 LB: > { %s893_s6 = sadd.s32 4294967295, %s822_s29   ;;  %s654_s30 = sadd.s32 4294967294, %s822_s29   ;;  %s822_s29 = sphi %s878_s29, %s1005_s29   ;;  %s818_s28 = sphi %s876_s28, %s1004_s28   ;;  %s814_s27 = sphi %s874_s27, %s1003_s27   ;;  %s810_s26 = sphi %s872_s26, %s1002_s26  }
   0x7   : > { %s897_s8 = sadd.s32 1, %s822_s29   ;;  %s191_s9 = sadd.s32 1, %s818_s28 }
   0x8   : > { %s188_s10 = ssub.s32 %s822_s29, %s897_s8  ;;  %p201_p0 = scmp.ne.s32.totalorder %s818_s28, %s814_s27 }
   0x9   : > { %p189_p1 = scmp.eq.s32.totalorder %s188_s10, 0  ;;  %p202_p2 = scmp.eq.s32.totalorder %s893_s6, 1 }
   0xa   : > { %p207_p3 = scmp.ne.s32.totalorder %s814_s27, %s810_s26  ;;  %p208_p4 = scmp.eq.s32.totalorder %s654_s30, 1 }
   0xb   : > { %s908_s11 = scalar_select %p189_p1, %s818_s28, %s191_s9  }
   0xc   : > { %p910_p5 = por %p202_p2, %p201_p0  ;;  %p914_p6 = por %p208_p4, %p207_p3 }
   0xd   : > { %p657_p7 = scmp.ge.s32.totalorder %s822_s29, 1  ;;  %p260_p8 = scmp.lt.s32.totalorder %s822_s29, 3 }
   0xf   : > { %p261_p9 = pnand %p657_p7, %p260_p8 }
  0x10   : > { %p300_p10 = scmp.lt.s32.totalorder (!%p261_p9), %s893_s6, 1  ;;  %s297_s23 = sand.u32 (!%p261_p9), 1, %s814_s27  }
  0x11   : > { %264 = sbr.rel (%p261_p9) target bundleno = 583 (0x247), region = 48  ;;  %s673_s25 = sshll.u32 (!%p261_p9), %s893_s6, 7 }
  0x12   : > { %s558_s16 = scalar_lea.sflag (!%p261_p9), [#allocation4], %s297_s23 }
  0x16   : > { %v343_v1 = vld [vmem:[%s995_s3 + $0x18] sm:$0xff]  ;;  %v824_v2 = vmov 0.0   ;;  %v342_v3 = vld [vmem:[%s995_s3 + $0x10] sm:$0xff]  ;;  %s301_s18 = scalar_select %p300_p10, %s893_s6, 1  ;;  %vm825_vm0 = vmmov 0   ;;  %v341_v4 = vld [vmem:[%s995_s3 + $0x8] sm:$0xff]  ;;  %v461_v14 = vlaneseq }
  0x17   : > { %685 = vmatprep.subr.mxu0 %v824_v2  ;;  %696 = vmatprep.subr.mxu1 %v824_v2  ;;  %v826_v5 = vmov 0   ;;  %vm440_vm1 = vcmask 80896   ;;  %v663_v6 = vld [vmem:[%s997_s5] ss:$0 sm:$0xff]  ;;  %vm322_vm2 = vcmask 261120   ;;  %vm478_vm3 = vcmask 1041408  }
  0x18   : > { %686 = vmatpush3.msra.mxu0 %v343_v1  ;;  %693 = vmatprep.mubr.msk.f32.mxu0 %vm825_vm0, %v824_v2  ;;  %s659_s21 = sshll.u32 %s301_s18, 3  ;;  %s676_s24 = sshll.u32 %s301_s18, 4  ;;  %v340_v7 = vld [vmem:[%s995_s3] sm:$0xff]  ;;  %v462_v15 = vand.u32 127, %v461_v14  ;;  %v827_v39 = vmov 1.0  }
  0x19   : > { %687 = vmatprep.subr.mxu0 %v824_v2  ;;  %746 = vset.pattern.permute.xlu1 %v826_v5  ;;  %s307_s9 = scalar_lea.vmem %s993_s1, %s659_s21  ;;  %s303_s15 = scalar_lea.vmem %s992_s0, %s659_s21  ;;  %v664_v20 = vld [vmem:[#allocation2] ss:$0 sm:$0xff] }
  0x1a   : > { %688 = vmatpush3.msra.mxu0 %v342_v3  ;;  %747 = vset.pattern.permute.xlu0 %v826_v5  ;;  %v439_v8 = vld [vmem:[%s307_s9] sm:$0xff]  ;;  %s948_s20 = scalar_lea.vmem %s994_s2, %s676_s24  ;;  %s658_s24 = sshll.u32 %s297_s23, 3 }
  0x1b   : > { %689 = vmatprep.subr.mxu0 %v824_v2  ;;  %700 = vmatprep.mubr.msk.f32.mxu1 %vm825_vm0, %v824_v2  ;;  %v313_v9 = vld [vmem:[%s303_s15] sm:$0xff]  ;;  %v441_v10 = vsel %vm440_vm1, %v439_v8, -inf  ;;  %v460_v12 = vld [vmem:[%s948_s20 + $0x8] sm:$0x3]  ;;  %s299_s30 = scalar_lea.vmem [#allocation3], %s658_s24  ;;  %s569_s15 = scalar_lea.hbm %s999_s7, %s673_s25 }
  0x1c   : > { %690 = vmatpush3.msra.mxu0 %v341_v4  ;;  %v321_v11 = vmul.f32 %v663_v6, %v313_v9  ;;  %442 = vmax.xlane.f32.xlu0 %v441_v10  ;;  %v459_v30 = vld [vmem:[%s948_s20] sm:$0xff]  ;;  %s571_s9 = sshll.u32 %s299_s30, 4  ;;  %s828_s18 = smov [#allocation3]   ;;  %s572_s9 = int_to_ptr.vmem [resolvable:$true] %s571_s9 }
  0x1d   : > { %691 = vmatprep.subr.mxu0 %v824_v2  ;;  %467 = vperm.xlu1 %746, %v460_v12   ;;  %v665_v35 = vld [vmem:[%s996_s4] ss:$0 sm:$0xff]  ;;  %s762_s17 = scalar_lea.vmem %s572_s9, 128  ;;  %s766_s19 = sshll.u32 %s828_s18, 4  ;;  %s767_s19 = int_to_ptr.vmem [resolvable:$false] %s766_s19 }
  0x1e   : > { %692 = vmatpush3.msra.mxu0 %v340_v7  ;;  %v323_v13 = vsel %vm322_vm2, %v321_v11, 0.0  ;;  %p763_p11 = scmp.ne.s32.totalorder %s572_s9, %s762_s17  ;;  %s768_s6 = scalar_lea.vmem %s767_s19, 256 }
  0x1f   : > { %694 = vmatmul.mubr.msk.f32.vlgmr.msra.gmra.mxu0 %vm322_vm2, %v313_v9  ;;  %p769_p0 = scmp.lt.s32.totalorder %s572_s9, %s767_s19  ;;  %p770_p1 = scmp.lt.s32.totalorder %s768_s6, %s762_s17 }
  0x20   : > { %324 = vadd.xlane.f32.xlu0 %v323_v13  ;;  %p764_p12 = pnand %p763_p11, %p910_p5 }
  0x21   : > { %p771_p2 = por %p770_p1, %p769_p0 }
  0x22   : > { %p765_p13 = pneg %p764_p12 }
  0x24   : > { %p772_p3 = pnand %p771_p2, %p765_p13 }
  0x98   : > { %v468_v16 = vpop.permute.xlu1 %467 }
  0x99   : > { %vm470_vm4 = vcmp.eq.s32.totalorder %v462_v15, %v468_v16 }
  0x9a   : > { %v668_v17 = vsel %vm470_vm4, 1.0, %v824_v2 }
  0x9b   : > { %697 = vmatpush3.msk.msra.mxu1 %vm478_vm3, %v668_v17 }
  0x9c   : > { %698 = vmatprep.subr.mxu1 %v824_v2 }
  0xa5   : > { %v443_v18 = vpop.xlane.xlu0 %442 }
  0xa6   : > { %v444_v19 = vsub.f32 %v439_v8, %v443_v18 }
  0xa8   : > { %v445_v21 = vmul.f32 1.442695, %v444_v19 }
  0xa9   : > { %v325_v22 = vpop.xlane.xlu0 %324 }
  0xaa   : > { %748 = vpow2.f32 %v445_v21  ;;  %v333_v23 = vadd.f32 %v664_v20, %v325_v22 }
  0xac   : > { %v334_v24 = vsub.f32 0.0, %v333_v23 }
  0xae   : > { %v335_v25 = vmul.f32 1.442695, %v334_v24 }
  0xb0   : > { %750 = vpow2.f32 %v335_v25 }
  0xb7   : > { %v749_v26 = vpop.eup %748 }
  0xb8   : > { %v447_v27 = vsel %vm440_vm1, %v749_v26, 0.0 }
  0xb9   : > { %448 = vadd.xlane.f32.xlu1 %v447_v27 }
  0xbd   : > { %v751_v28 = vpop.eup %750 }
  0xbe   : > { %v337_v29 = vadd.f32 1.0, %v751_v28 }
  0xc0   : > { %752 = vrcp.f32 %v337_v29 }
  0xca   : > { %464 = vperm.xlu1 %746, %v459_v30  }
  0xcd   : > { %v753_v31 = vpop.eup %752 }
  0xce   : > { %v452_v32 = vsub.f32 1.0, %v753_v31 }
  0xd0   : > { %455 = vperm.xlu0 %747, %v452_v32  }
  0xdf   : > { %v420_v33 = vpop.f32.mrf.mxu0 }
  0xe0   : > { %v421_v36 = vadd.f32 %v665_v35, %v420_v33 }
  0xe1   : > { %v695_v34 = vpop.f32.mrf.mxu0 }
  0xee   : > { %424 = vmax.xlane.f32.xlu1 %v421_v36 }
  0xff   : > { %435 = vperm.xlu1 %746, %v753_v31  }
 0x142   : > { %v449_v37 = vpop.xlane.xlu1 %448 }
 0x143   : > { %754 = vrcp.f32 %v449_v37 }
 0x146   : > { %v465_v38 = vpop.permute.xlu1 %464 }
 0x147   : > { %vm469_vm5 = vcmp.eq.s32.totalorder %v462_v15, %v465_v38 }
 0x148   : > { %699 = vmatpush3.msk.msra.mxu1 %vm469_vm5, %v827_v39 }
 0x14b   : > { %v456_v41 = vpop.permute.xlu0 %455 }
 0x150   : > { %v755_v40 = vpop.eup %754 }
 0x151   : > { %v451_v42 = vmul.f32 %v755_v40, %v749_v26 }
 0x153   : > { %v458_v43 = vmul.f32 %v456_v41, %v451_v42 }
 0x155   : > { %701 = vmatmul.mubr.msk.f32.vlgmr.msra.gmra.mxu1 %vm440_vm1, %v458_v43 }
 0x177   : > { %v425_v44 = vpop.xlane.xlu1 %424 }
 0x178   : > { %v426_v45 = vsub.f32 %v421_v36, %v425_v44 }
 0x17a   : > { %v427_v46 = vmul.f32 1.442695, %v426_v45 }
 0x17b   : > { %v436_v53 = vpop.permute.xlu1 %435 }
 0x17c   : > { %756 = vpow2.f32 %v427_v46 }
 0x189   : > { %v757_v47 = vpop.eup %756 }
 0x18a   : > { %429 = vadd.xlane.f32.xlu0 %v757_v47 }
 0x213   : > { %v430_v48 = vpop.xlane.xlu0 %429 }
 0x214   : > { %758 = vrcp.f32 %v430_v48 }
 0x215   : > { %v548_v49 = vpop.f32.mrf.mxu1 }
 0x217   : > { %v702_v50 = vpop.f32.mrf.mxu1 }
 0x221   : > { %v759_v51 = vpop.eup %758 }
 0x222   : > { %v432_v52 = vmul.f32 %v759_v51, %v757_v47 }
 0x224   : > { %v438_v54 = vmul.f32 %v436_v53, %v432_v52 }
 0x226   : > { %v552_v55 = vadd.f32 %v548_v49, %v438_v54 }
 0x228   : > { %v553_v56 = vadd.f32 1e-18, %v552_v55 }
 0x22a   : > { %760 = vlog2.f32 %v553_v56 }
 0x237   : > { %v761_v57 = vpop.eup %760 }
 0x238   : > { %v555_v58 = vmul.f32 0.6931472, %v761_v57 }
 0x23a   : > { %556 = vst [vmem:[%s299_s30] sm:$0xff] %v555_v58 }
 0x23b   : > { %775 = shalt.err (!%p772_p3)
}
 0x23c   : > { %s776_s20 = scalar_lea.hbm %s569_s15, 128  ;;  %s780_s23 = scalar_lea.hbm %s999_s7, 256 }
 0x23d   : > { %p777_p4 = scmp.ne.s32.totalorder %s569_s15, %s776_s20  ;;  %p781_p9 = scmp.lt.s32.totalorder %s569_s15, %s999_s7 }
 0x23e   : > { %p782_p10 = scmp.lt.s32.totalorder %s780_s23, %s776_s20 }
 0x23f   : > { %p778_p7 = pnand %p777_p4, %p910_p5 }
 0x240   : > { %p783_p11 = por %p782_p10, %p781_p9 }
 0x241   : > { %p779_p8 = pneg %p778_p7 }
 0x243   : > { %p784_p12 = pnand %p783_p11, %p779_p8 }
 0x245   : > { %787 = shalt.err (!%p784_p12)
}
 0x246   : > { %703 = dma.vmem_to_hbm [thread:$0]  (%p910_p5), %s572_s9, 128, %s569_s15, %s558_s16  }
 0x247 PF: > { %p709_p13 = scmp.ge.s32.totalorder %s822_s29, 2  ;;  %s583_s30 = sand.u32 1, %s810_s26  }
 0x248   : > { %s584_s10 = scalar_lea.sflag [#allocation4], %s583_s30 }
 0x249   : > { %p706_p0 = pnand %p709_p13, %p914_p6 }
 0x24b   : > { %p707_p1 = pneg %p706_p0 }
 0x24d   : > { %805 = dma.done.wait (%p707_p1), %s584_s10, 128  }
 0x24e   : > { %807 = vsyncadd (%p707_p1), %s584_s10, 4294967168  ;;  %p19_p2 = scmp.ge.s32.totalorder %s897_s8, 4   ;;  %s1002_s26 = smov %s814_s27 }
 0x24f   : > { %s1003_s27 = smov %s818_s28  ;;  %s1004_s28 = smov %s908_s11 }
 0x250   : > { %s1005_s29 = smov %s897_s8  ;;  %21 = sbr.rel (!%p19_p2) target bundleno = 6 (0x6), region = 89 }
 0x255   :  { %589 = vsyncpa [#allocation4], 1 }
 0x256   :  { %591 = vsyncpa [#allocation4 + $0x1], 1 }

</bundles_post_ra>
